<compile_context>
chip_gen: v5e
topology: v5e:2x2
jax: 0.10.0
libtpu: 0.0.40
codegen_flags: <defaults>
</compile_context>

<pallas_src>
import jax
import jax.numpy as jnp
from jax import lax
from jax.experimental import pallas as pl
from jax.experimental.pallas import tpu as pltpu


def _round_up(x, m):
    return ((x + m - 1) // m) * m


def vtm_kernel(v_ref, t_ref, w_ref, b_ref, o_ref):
    # Full (tiny) arrays resident in VMEM; compute in f32.
    v = v_ref[...]                                   # (Bv_p, D)
    t = t_ref[...]                                   # (Bt_p, H)
    w = w_ref[...]                                   # (H,   D)
    b = b_ref[...]                                   # (1,   D)

    # Linear projection: (Bt_p, H) @ (H, D) + (1, D) -> (Bt_p, D)
    proj = jnp.dot(t, w, preferred_element_type=jnp.float32) + b

    # max(sqrt(s), eps) == sqrt(max(s, eps^2))  ->  single rsqrt per row.
    eps2 = jnp.float32(1e-8) * jnp.float32(1e-8)
    inv_v = lax.rsqrt(jnp.maximum(jnp.sum(v * v, axis=-1, keepdims=True), eps2))
    inv_t = lax.rsqrt(jnp.maximum(jnp.sum(proj * proj, axis=-1, keepdims=True), eps2))

    # Normalize rows BEFORE the pairwise matmul: one dot gives cosine directly.
    v_n = v * inv_v                                  # (Bv_p, D)
    t_n = proj * inv_t                               # (Bt_p, D)

    # Contract D against D (trans_b) — no in-kernel transpose of proj.
    sim = lax.dot_general(
        v_n, t_n,
        dimension_numbers=(((1,), (1,)), ((), ())),
        preferred_element_type=jnp.float32)          # (Bv_p, Bt_p)
    o_ref[...] = sim.astype(o_ref.dtype)


def prepare_proj_params(proj_w, proj_b):
    """Done ONCE at init (frozen nn.Linear(768, D) parameters).
    proj_w: (D, 768) PyTorch-layout weight; proj_b: (D,)."""
    w_t = jnp.asarray(proj_w, jnp.float32).T           # (768, D)
    b_row = jnp.asarray(proj_b, jnp.float32)[None, :]  # (1, D)
    return w_t, b_row


@jax.jit
def vision_text_matching(vision_feature, text_pooled, w_t, b_row):
    """vision_feature: (Bv, D); text_pooled: (Bt, 768);
    w_t: (768, D) pre-transposed weight; b_row: (1, D) bias."""
    Bv, D = vision_feature.shape
    Bt, H = text_pooled.shape
    assert w_t.shape == (H, D) and b_row.shape == (1, D)

    # Pad batch dims to the 8-sublane boundary only; D/H are left untouched
    # (full-array VMEM blocks accept a non-128 lane dim; layout pads in-vreg).
    Bv_p = _round_up(Bv, 8)
    Bt_p = _round_up(Bt, 8)
    v_p = jnp.pad(vision_feature.astype(jnp.float32), ((0, Bv_p - Bv), (0, 0)))
    t_p = jnp.pad(text_pooled.astype(jnp.float32), ((0, Bt_p - Bt), (0, 0)))

    sim_p = pl.pallas_call(
        vtm_kernel,
        out_shape=jax.ShapeDtypeStruct((Bv_p, Bt_p), jnp.float32),
        # No grid: single invocation, whole (tiny) arrays live in VMEM.
        in_specs=[
            pl.BlockSpec(memory_space=pltpu.MemorySpace.VMEM),
            pl.BlockSpec(memory_space=pltpu.MemorySpace.VMEM),
            pl.BlockSpec(memory_space=pltpu.MemorySpace.VMEM),
            pl.BlockSpec(memory_space=pltpu.MemorySpace.VMEM),
        ],
        out_specs=pl.BlockSpec(memory_space=pltpu.MemorySpace.VMEM),
    )(v_p, t_p, w_t, b_row)

    # Drop padded rows/columns (padded vision rows are exactly 0 after the
    # eps clamp; padded text rows project to bias-only and are sliced off).
    return sim_p[:Bv, :Bt]


def tiny_bert_pooler_stub(input_ids, attention_mask, embed_table,
                          pooler_w, pooler_b):
    """Deterministic stand-in for `bert(input_ids, attention_mask).pooler_output`.
    Plain-JAX glue (frozen / no_grad in the original module)."""
    emb = embed_table[input_ids]                               # (Bt, S, H)
    mask = attention_mask.astype(jnp.float32)[..., None]       # (Bt, S, 1)
    pooled = jnp.sum(emb * mask, axis=1) / jnp.maximum(
        jnp.sum(mask, axis=1), 1.0)                            # (Bt, H)
    return jnp.tanh(pooled @ pooler_w + pooler_b)              # (Bt, H)


if __name__ == "__main__":
    key = jax.random.PRNGKey(0)
    k_v, k_w, k_b, k_emb, k_pw, k_pb, k_ids = jax.random.split(key, 7)

    # Small shapes consistent with the module.
    Bv = 4          # number of vision features
    Bt = 4          # number of text samples
    D = 32          # input_dim (shared feature dim)
    H = 768         # BERT hidden size (fixed by nn.Linear(768, input_dim))
    S = 8           # sequence length
    VOCAB = 100

    # Deterministic parameters.
    proj_w = jax.random.normal(k_w, (D, H), dtype=jnp.float32) * 0.02   # nn.Linear weight (out, in)
    proj_b = jax.random.normal(k_b, (D,), dtype=jnp.float32) * 0.02
    embed_table = jax.random.normal(k_emb, (VOCAB, H), dtype=jnp.float32) * 0.02
    pooler_w = jax.random.normal(k_pw, (H, H), dtype=jnp.float32) * 0.02
    pooler_b = jax.random.normal(k_pb, (H,), dtype=jnp.float32) * 0.02

    # Frozen-parameter preparation happens once, OUTSIDE the per-call path.
    w_t, b_row = prepare_proj_params(proj_w, proj_b)

    # Inputs.
    vision_feature = jax.random.normal(k_v, (Bv, D), dtype=jnp.float32)
    input_ids = jax.random.randint(k_ids, (Bt, S), 0, VOCAB)
    attention_mask = jnp.ones((Bt, S), dtype=jnp.int32)

    # Frozen BERT stand-in (glue).
    text_pooled = tiny_bert_pooler_stub(
        input_ids, attention_mask, embed_table, pooler_w, pooler_b)

    # Pallas kernel: projection + pairwise cosine similarity.
    sim = vision_text_matching(vision_feature, text_pooled, w_t, b_row)
    sim = jax.block_until_ready(sim)

    # Sanity check against a plain-JAX reference (F.cosine_similarity semantics).
    proj_ref = text_pooled @ proj_w.T + proj_b
    v_n = vision_feature / jnp.maximum(
        jnp.linalg.norm(vision_feature, axis=-1, keepdims=True), 1e-8)
    t_n = proj_ref / jnp.maximum(
        jnp.linalg.norm(proj_ref, axis=-1, keepdims=True), 1e-8)
    ref = v_n @ t_n.T
    assert sim.shape == (Bv, Bt)
    assert jnp.allclose(sim, ref, atol=1e-4, rtol=1e-4), (sim, ref)

    print("KERNEL_OK")
</pallas_src>

<mosaic_0001>
module attributes {stable_mosaic.version = 11 : i64} {
  func.func @vtm_kernel(%arg0: memref<8x32xf32, #tpu.memory_space<vmem>>, %arg1: memref<8x768xf32, #tpu.memory_space<vmem>>, %arg2: memref<768x32xf32, #tpu.memory_space<vmem>>, %arg3: memref<1x32xf32, #tpu.memory_space<vmem>>, %arg4: memref<8x8xf32, #tpu.memory_space<vmem>>) attributes {dimension_semantics = [], scalar_prefetch = 0 : i64, scratch_operands = 0 : i64, tpu.core_type = #tpu.core_type<tc>} {
    %c0 = arith.constant 0 : index
    %c0_0 = arith.constant 0 : index
    %0 = vector.load %arg0[%c0, %c0_0] : memref<8x32xf32, #tpu.memory_space<vmem>>, vector<8x32xf32>
    %c0_1 = arith.constant 0 : index
    %c0_2 = arith.constant 0 : index
    %1 = vector.load %arg1[%c0_1, %c0_2] : memref<8x768xf32, #tpu.memory_space<vmem>>, vector<8x768xf32>
    %c0_3 = arith.constant 0 : index
    %c0_4 = arith.constant 0 : index
    %2 = vector.load %arg2[%c0_3, %c0_4] : memref<768x32xf32, #tpu.memory_space<vmem>>, vector<768x32xf32>
    %c0_5 = arith.constant 0 : index
    %c0_6 = arith.constant 0 : index
    %3 = vector.load %arg3[%c0_5, %c0_6] : memref<1x32xf32, #tpu.memory_space<vmem>>, vector<1x32xf32>
    %cst = arith.constant dense<0.000000e+00> : vector<8x32xf32>
    %4 = tpu.matmul %1, %2, %cst {dimension_numbers = #tpu.dot_dimension_numbers<[1], [0], [0], [1], [0, 0, 1, 1], [], []>} : vector<8x768xf32>, vector<768x32xf32>, vector<8x32xf32> -> vector<8x32xf32>
    %5 = vector.broadcast %3 : vector<1x32xf32> to vector<8x32xf32>
    %6 = arith.addf %4, %5 : vector<8x32xf32>
    %cst_7 = arith.constant 9.99999993E-9 : f32
    %cst_8 = arith.constant 9.99999993E-9 : f32
    %7 = arith.mulf %cst_7, %cst_8 : f32
    %8 = arith.mulf %0, %0 : vector<8x32xf32>
    %cst_9 = arith.constant dense<0.000000e+00> : vector<8xf32>
    %9 = vector.multi_reduction <add>, %8, %cst_9 [1] : vector<8x32xf32> to vector<8xf32>
    %10 = vector.shape_cast %9 : vector<8xf32> to vector<8x1xf32>
    %11 = vector.broadcast %7 : f32 to vector<8x1xf32>
    %12 = arith.maximumf %10, %11 : vector<8x1xf32>
    %13 = math.rsqrt %12 : vector<8x1xf32>
    %14 = arith.mulf %6, %6 : vector<8x32xf32>
    %cst_10 = arith.constant dense<0.000000e+00> : vector<8xf32>
    %15 = vector.multi_reduction <add>, %14, %cst_10 [1] : vector<8x32xf32> to vector<8xf32>
    %16 = vector.shape_cast %15 : vector<8xf32> to vector<8x1xf32>
    %17 = vector.broadcast %7 : f32 to vector<8x1xf32>
    %18 = arith.maximumf %16, %17 : vector<8x1xf32>
    %19 = math.rsqrt %18 : vector<8x1xf32>
    %20 = vector.broadcast %13 : vector<8x1xf32> to vector<8x32xf32>
    %21 = arith.mulf %0, %20 : vector<8x32xf32>
    %22 = vector.broadcast %19 : vector<8x1xf32> to vector<8x32xf32>
    %23 = arith.mulf %6, %22 : vector<8x32xf32>
    %cst_11 = arith.constant dense<0.000000e+00> : vector<8x8xf32>
    %24 = tpu.matmul %21, %23, %cst_11 {dimension_numbers = #tpu.dot_dimension_numbers<[1], [1], [0], [0], [0, 0, 1, 0], [], []>} : vector<8x32xf32>, vector<8x32xf32>, vector<8x8xf32> -> vector<8x8xf32>
    %c0_12 = arith.constant 0 : index
    %c0_13 = arith.constant 0 : index
    %25 = vector.load %arg4[%c0_12, %c0_13] : memref<8x8xf32, #tpu.memory_space<vmem>>, vector<8x8xf32>
    tpu.vector_store %arg4[%c0_12, %c0_13], %24 {strides = array<i32>} : memref<8x8xf32, #tpu.memory_space<vmem>>, vector<8x8xf32>,
    return
  }
}

</mosaic_0001>

<bundles_post_ra>
// kernel: vision_text_matching.1
= control target key start
LH: loop header
LB: loop body
LE: loop exit
PB: predicated region body
PF: predicated region fallthrough
CT: control target
= control target key end

     0   :  { %vm245_vm0 = vcmask 261120   ;;  %vm303_vm7 = vcmask 64512   ;;  %s660_s2 = inlined_call_operand.vmem [shape: f32[768,32], index: 2, kind: input, shape index: {}]   ;;  %s661_s3 = inlined_call_operand.vmem [shape: f32[1,32], index: 3, kind: input, shape index: {}]   ;;  %s662_s1 = inlined_call_operand.vmem [shape: f32[8,768], index: 1, kind: input, shape index: {}]   ;;  %s663_s0 = inlined_call_operand.vmem [shape: f32[8,32], index: 0, kind: input, shape index: {}]   ;;  %s664_s4 = inlined_call_operand.vmem [shape: f32[8,8], index: 4, kind: output, shape index: {}]  }
   0x1   :  { %v39_v0 = vld [vmem:[%s660_s2 + $0x78] sm:$0xff]  ;;  %v38_v1 = vld [vmem:[%s660_s2 + $0x70] sm:$0xff]  ;;  %v37_v4 = vld [vmem:[%s660_s2 + $0x68] sm:$0xff] }
   0x2   :  { %v55_v2 = vld [vmem:[%s660_s2 + $0xf8] sm:$0xff]  ;;  %124 = vmatpush.msra.mxu0 %v39_v0  ;;  %v54_v3 = vld [vmem:[%s660_s2 + $0xf0] sm:$0xff]  ;;  %v53_v5 = vld [vmem:[%s660_s2 + $0xe8] sm:$0xff] }
   0x3   :  { %144 = vmatpush.msra.mxu1 %v55_v2  ;;  %v36_v6 = vld [vmem:[%s660_s2 + $0x60] sm:$0xff]  ;;  %v35_v8 = vld [vmem:[%s660_s2 + $0x58] sm:$0xff]  ;;  %v34_v10 = vld [vmem:[%s660_s2 + $0x50] sm:$0xff] }
   0x4   :  { %125 = vmatpush.msra.mxu0 %v38_v1  ;;  %v52_v7 = vld [vmem:[%s660_s2 + $0xe0] sm:$0xff]  ;;  %v51_v9 = vld [vmem:[%s660_s2 + $0xd8] sm:$0xff]  ;;  %v50_v12 = vld [vmem:[%s660_s2 + $0xd0] sm:$0xff] }
   0x5   :  { %145 = vmatpush.msra.mxu1 %v54_v3  ;;  %v71_v11 = vld [vmem:[%s660_s2 + $0x178] sm:$0xff]  ;;  %v70_v13 = vld [vmem:[%s660_s2 + $0x170] sm:$0xff]  ;;  %v69_v15 = vld [vmem:[%s660_s2 + $0x168] sm:$0xff] }
   0x6   :  { %126 = vmatpush.msra.mxu0 %v37_v4  ;;  %164 = vmatpush.msra.mxu2 %v71_v11  ;;  %v87_v14 = vld [vmem:[%s660_s2 + $0x1f8] sm:$0xff]  ;;  %v86_v16 = vld [vmem:[%s660_s2 + $0x1f0] sm:$0xff]  ;;  %v33_v17 = vld [vmem:[%s660_s2 + $0x48] sm:$0xff] }
   0x7   :  { %146 = vmatpush.msra.mxu1 %v53_v5  ;;  %v49_v18 = vld [vmem:[%s660_s2 + $0xc8] sm:$0xff]  ;;  %184 = vmatpush.msra.mxu3 %v87_v14  ;;  %v68_v19 = vld [vmem:[%s660_s2 + $0x160] sm:$0xff]  ;;  %v67_v23 = vld [vmem:[%s660_s2 + $0x158] sm:$0xff] }
   0x8   :  { %127 = vmatpush.msra.mxu0 %v36_v6  ;;  %165 = vmatpush.msra.mxu2 %v70_v13  ;;  %v85_v20 = vld [vmem:[%s660_s2 + $0x1e8] sm:$0xff]  ;;  %v32_v21 = vld [vmem:[%s660_s2 + $0x40] sm:$0xff]  ;;  %v31_v25 = vld [vmem:[%s660_s2 + $0x38] sm:$0xff] }
   0x9   :  { %147 = vmatpush.msra.mxu1 %v52_v7  ;;  %v48_v22 = vld [vmem:[%s660_s2 + $0xc0] sm:$0xff]  ;;  %185 = vmatpush.msra.mxu3 %v86_v16  ;;  %v47_v26 = vld [vmem:[%s660_s2 + $0xb8] sm:$0xff]  ;;  %v66_v27 = vld [vmem:[%s660_s2 + $0x150] sm:$0xff] }
   0xa   :  { %128 = vmatpush.msra.mxu0 %v35_v8  ;;  %166 = vmatpush.msra.mxu2 %v69_v15  ;;  %v84_v24 = vld [vmem:[%s660_s2 + $0x1e0] sm:$0xff]  ;;  %v83_v28 = vld [vmem:[%s660_s2 + $0x1d8] sm:$0xff]  ;;  %v30_v29 = vld [vmem:[%s660_s2 + $0x30] sm:$0xff] }
   0xb   :  { %148 = vmatpush.msra.mxu1 %v51_v9  ;;  %186 = vmatpush.msra.mxu3 %v85_v20  ;;  %v46_v30 = vld [vmem:[%s660_s2 + $0xb0] sm:$0xff]  ;;  %v65_v31 = vld [vmem:[%s660_s2 + $0x148] sm:$0xff]  ;;  %v64_v35 = vld [vmem:[%s660_s2 + $0x140] sm:$0xff] }
   0xc   :  { %129 = vmatpush.msra.mxu0 %v34_v10  ;;  %167 = vmatpush.msra.mxu2 %v68_v19  ;;  %v82_v32 = vld [vmem:[%s660_s2 + $0x1d0] sm:$0xff]  ;;  %v29_v33 = vld [vmem:[%s660_s2 + $0x28] sm:$0xff]  ;;  %v28_v37 = vld [vmem:[%s660_s2 + $0x20] sm:$0xff] }
   0xd   :  { %149 = vmatpush.msra.mxu1 %v50_v12  ;;  %187 = vmatpush.msra.mxu3 %v84_v24  ;;  %v45_v34 = vld [vmem:[%s660_s2 + $0xa8] sm:$0xff]  ;;  %v44_v38 = vld [vmem:[%s660_s2 + $0xa0] sm:$0xff]  ;;  %v63_v39 = vld [vmem:[%s660_s2 + $0x138] sm:$0xff] }
   0xe   :  { %130 = vmatpush.msra.mxu0 %v33_v17  ;;  %168 = vmatpush.msra.mxu2 %v67_v23  ;;  %v81_v36 = vld [vmem:[%s660_s2 + $0x1c8] sm:$0xff]  ;;  %v80_v40 = vld [vmem:[%s660_s2 + $0x1c0] sm:$0xff]  ;;  %v27_v41 = vld [vmem:[%s660_s2 + $0x18] sm:$0xff] }
   0xf   :  { %150 = vmatpush.msra.mxu1 %v49_v18  ;;  %188 = vmatpush.msra.mxu3 %v83_v28  ;;  %v43_v42 = vld [vmem:[%s660_s2 + $0x98] sm:$0xff]  ;;  %v62_v43 = vld [vmem:[%s660_s2 + $0x130] sm:$0xff]  ;;  %v61_v47 = vld [vmem:[%s660_s2 + $0x128] sm:$0xff] }
  0x10   :  { %131 = vmatpush.msra.mxu0 %v32_v21  ;;  %169 = vmatpush.msra.mxu2 %v66_v27  ;;  %v79_v44 = vld [vmem:[%s660_s2 + $0x1b8] sm:$0xff]  ;;  %v26_v45 = vld [vmem:[%s660_s2 + $0x10] sm:$0xff]  ;;  %v25_v49 = vld [vmem:[%s660_s2 + $0x8] sm:$0xff] }
  0x11   :  { %151 = vmatpush.msra.mxu1 %v48_v22  ;;  %189 = vmatpush.msra.mxu3 %v82_v32  ;;  %v42_v46 = vld [vmem:[%s660_s2 + $0x90] sm:$0xff]  ;;  %v41_v50 = vld [vmem:[%s660_s2 + $0x88] sm:$0xff]  ;;  %v60_v51 = vld [vmem:[%s660_s2 + $0x120] sm:$0xff] }
  0x12   :  { %132 = vmatpush.msra.mxu0 %v31_v25  ;;  %170 = vmatpush.msra.mxu2 %v65_v31  ;;  %v78_v48 = vld [vmem:[%s660_s2 + $0x1b0] sm:$0xff]  ;;  %v77_v52 = vld [vmem:[%s660_s2 + $0x1a8] sm:$0xff]  ;;  %v24_v53 = vld [vmem:[%s660_s2] sm:$0xff] }
  0x13   :  { %152 = vmatpush.msra.mxu1 %v47_v26  ;;  %190 = vmatpush.msra.mxu3 %v81_v36  ;;  %v40_v54 = vld [vmem:[%s660_s2 + $0x80] sm:$0xff]  ;;  %v103_v55 = vld [vmem:[%s660_s2 + $0x278] sm:$0xff]  ;;  %v102_v59 = vld [vmem:[%s660_s2 + $0x270] sm:$0xff] }
  0x14   :  { %133 = vmatpush.msra.mxu0 %v30_v29  ;;  %171 = vmatpush.msra.mxu2 %v64_v35  ;;  %v119_v56 = vld [vmem:[%s660_s2 + $0x2f8] sm:$0xff]  ;;  %v76_v58 = vld [vmem:[%s660_s2 + $0x1a0] sm:$0xff]  ;;  %v118_v60 = vld [vmem:[%s660_s2 + $0x2f0] sm:$0xff] }
  0x15   :  { %153 = vmatpush.msra.mxu1 %v46_v30  ;;  %191 = vmatpush.msra.mxu3 %v80_v40  ;;  %v59_v57 = vld [vmem:[%s660_s2 + $0x118] sm:$0xff]  ;;  %v58_v61 = vld [vmem:[%s660_s2 + $0x110] sm:$0xff]  ;;  %v101_v63 = vld [vmem:[%s660_s2 + $0x268] sm:$0xff] }
  0x16   :  { %134 = vmatpush.msra.mxu0 %v29_v33  ;;  %172 = vmatpush.msra.mxu2 %v63_v39  ;;  %v75_v62 = vld [vmem:[%s660_s2 + $0x198] sm:$0xff]  ;;  %v117_v0 = vld [vmem:[%s660_s2 + $0x2e8] sm:$0xff]  ;;  %v74_v2 = vld [vmem:[%s660_s2 + $0x190] sm:$0xff] }
  0x17   :  { %154 = vmatpush.msra.mxu1 %v45_v34  ;;  %192 = vmatpush.msra.mxu3 %v79_v44  ;;  %v57_v1 = vld [vmem:[%s660_s2 + $0x108] sm:$0xff]  ;;  %v100_v3 = vld [vmem:[%s660_s2 + $0x260] sm:$0xff]  ;;  %v99_v7 = vld [vmem:[%s660_s2 + $0x258] sm:$0xff] }
  0x18   :  { %135 = vmatpush.msra.mxu0 %v28_v37  ;;  %173 = vmatpush.msra.mxu2 %v62_v43  ;;  %v116_v4 = vld [vmem:[%s660_s2 + $0x2e0] sm:$0xff]  ;;  %v73_v6 = vld [vmem:[%s660_s2 + $0x188] sm:$0xff]  ;;  %v115_v8 = vld [vmem:[%s660_s2 + $0x2d8] sm:$0xff] }
  0x19   :  { %155 = vmatpush.msra.mxu1 %v44_v38  ;;  %193 = vmatpush.msra.mxu3 %v78_v48  ;;  %v56_v5 = vld [vmem:[%s660_s2 + $0x100] sm:$0xff]  ;;  %v20_v9 = vld [vmem:[%s662_s1 + $0x10] sm:$0xff]  ;;  %v21_v14 = vld [vmem:[%s662_s1 + $0x18] sm:$0xff] }
  0x1a   :  { %136 = vmatpush.msra.mxu0 %v27_v41  ;;  %174 = vmatpush.msra.mxu2 %v61_v47  ;;  %v72_v10 = vld [vmem:[%s660_s2 + $0x180] sm:$0xff]  ;;  %v98_v11 = vld [vmem:[%s660_s2 + $0x250] sm:$0xff]  ;;  %v97_v15 = vld [vmem:[%s660_s2 + $0x248] sm:$0xff] }
  0x1b   :  { %156 = vmatpush.msra.mxu1 %v43_v42  ;;  %194 = vmatpush.msra.mxu3 %v77_v52  ;;  %v114_v12 = vld [vmem:[%s660_s2 + $0x2d0] sm:$0xff]  ;;  %v18_v13 = vld [vmem:[%s662_s1] sm:$0xff]  ;;  %v113_v16 = vld [vmem:[%s660_s2 + $0x2c8] sm:$0xff] }
  0x1c   :  { %137 = vmatpush.msra.mxu0 %v26_v45  ;;  %175 = vmatpush.msra.mxu2 %v60_v51  ;;  %v19_v17 = vld [vmem:[%s662_s1 + $0x8] sm:$0xff]  ;;  %v96_v18 = vld [vmem:[%s660_s2 + $0x240] sm:$0xff]  ;;  %v95_v20 = vld [vmem:[%s660_s2 + $0x238] sm:$0xff] }
  0x1d   :  { %157 = vmatpush.msra.mxu1 %v42_v46  ;;  %195 = vmatpush.msra.mxu3 %v76_v58  ;;  %v112_v19 = vld [vmem:[%s660_s2 + $0x2c0] sm:$0xff]  ;;  %v111_v21 = vld [vmem:[%s660_s2 + $0x2b8] sm:$0xff]  ;;  %v94_v22 = vld [vmem:[%s660_s2 + $0x230] sm:$0xff] }
  0x1e   :  { %138 = vmatpush.msra.mxu0 %v25_v49  ;;  %176 = vmatpush.msra.mxu2 %v59_v57  ;;  %v110_v23 = vld [vmem:[%s660_s2 + $0x2b0] sm:$0xff]  ;;  %v93_v24 = vld [vmem:[%s660_s2 + $0x228] sm:$0xff]  ;;  %v92_v26 = vld [vmem:[%s660_s2 + $0x220] sm:$0xff] }
  0x1f   :  { %158 = vmatpush.msra.mxu1 %v41_v50  ;;  %196 = vmatpush.msra.mxu3 %v75_v62  ;;  %v109_v25 = vld [vmem:[%s660_s2 + $0x2a8] sm:$0xff]  ;;  %v108_v27 = vld [vmem:[%s660_s2 + $0x2a0] sm:$0xff]  ;;  %v91_v28 = vld [vmem:[%s660_s2 + $0x218] sm:$0xff] }
  0x20   :  { %139 = vmatpush.msra.mxu0 %v24_v53  ;;  %177 = vmatpush.msra.mxu2 %v58_v61  ;;  %v107_v29 = vld [vmem:[%s660_s2 + $0x298] sm:$0xff]  ;;  %v90_v30 = vld [vmem:[%s660_s2 + $0x210] sm:$0xff]  ;;  %v89_v32 = vld [vmem:[%s660_s2 + $0x208] sm:$0xff] }
  0x21   :  { %159 = vmatpush.msra.mxu1 %v40_v54  ;;  %197 = vmatpush.msra.mxu3 %v74_v2  ;;  %v106_v31 = vld [vmem:[%s660_s2 + $0x290] sm:$0xff]  ;;  %v105_v33 = vld [vmem:[%s660_s2 + $0x288] sm:$0xff]  ;;  %v88_v34 = vld [vmem:[%s660_s2 + $0x200] sm:$0xff] }
  0x22   :  { %204 = vmatpush.msrb.mxu0 %v103_v55  ;;  %178 = vmatpush.msra.mxu2 %v57_v1  ;;  %v104_v35 = vld [vmem:[%s660_s2 + $0x280] sm:$0xff]  ;;  %v23_v37 = vld [vmem:[%s662_s1 + $0x28] sm:$0xff] }
  0x23   :  { %224 = vmatpush.msrb.mxu1 %v119_v56  ;;  %198 = vmatpush.msra.mxu3 %v73_v6  ;;  %v22_v36 = vld [vmem:[%s662_s1 + $0x20] sm:$0xff] }
  0x24   :  { %205 = vmatpush.msrb.mxu0 %v102_v59  ;;  %179 = vmatpush.msra.mxu2 %v56_v5  ;;  %v311_v38 = vld [vmem:[%s661_s3] ss:$0 sm:$0xff] }
  0x25   :  { %225 = vmatpush.msrb.mxu1 %v118_v60  ;;  %180 = vmatmul.f32.vlgmr.msra.gmra.mxu2 %v20_v9  ;;  %v17_v52 = vld [vmem:[%s663_s0] sm:$0xff] }
  0x26   :  { %206 = vmatpush.msrb.mxu0 %v101_v63  ;;  %199 = vmatpush.msra.mxu3 %v72_v10  ;;  %v244_v54 = vmul.f32 %v17_v52, %v17_v52 }
  0x27   :  { %226 = vmatpush.msrb.mxu1 %v117_v0  ;;  %140 = vmatmul.f32.vlgmr.msra.gmra.mxu0 %v18_v13 }
  0x28   :  { %207 = vmatpush.msrb.mxu0 %v100_v3  ;;  %200 = vmatmul.f32.vlgmr.msra.gmra.mxu3 %v21_v14  ;;  %v246_v55 = vsel %vm245_vm0, %v244_v54, 0.0 }
  0x29   :  { %227 = vmatpush.msrb.mxu1 %v116_v4 }
  0x2a   :  { %208 = vmatpush.msrb.mxu0 %v99_v7  ;;  %160 = vmatmul.f32.vlgmr.msra.gmra.mxu1 %v19_v17 }
  0x2b   :  { %228 = vmatpush.msrb.mxu1 %v115_v8 }
  0x2c   :  { %209 = vmatpush.msrb.mxu0 %v98_v11 }
  0x2d   :  { %229 = vmatpush.msrb.mxu1 %v114_v12 }
  0x2e   :  { %210 = vmatpush.msrb.mxu0 %v97_v15 }
  0x2f   :  { %230 = vmatpush.msrb.mxu1 %v113_v16 }
  0x30   :  { %211 = vmatpush.msrb.mxu0 %v96_v18 }
  0x31   :  { %231 = vmatpush.msrb.mxu1 %v112_v19 }
  0x32   :  { %212 = vmatpush.msrb.mxu0 %v95_v20 }
  0x33   :  { %232 = vmatpush.msrb.mxu1 %v111_v21 }
  0x34   :  { %213 = vmatpush.msrb.mxu0 %v94_v22 }
  0x35   :  { %233 = vmatpush.msrb.mxu1 %v110_v23 }
  0x36   :  { %214 = vmatpush.msrb.mxu0 %v93_v24 }
  0x37   :  { %234 = vmatpush.msrb.mxu1 %v109_v25 }
  0x38   :  { %215 = vmatpush.msrb.mxu0 %v92_v26 }
  0x39   :  { %235 = vmatpush.msrb.mxu1 %v108_v27 }
  0x3a   :  { %216 = vmatpush.msrb.mxu0 %v91_v28 }
  0x3b   :  { %236 = vmatpush.msrb.mxu1 %v107_v29 }
  0x3c   :  { %217 = vmatpush.msrb.mxu0 %v90_v30 }
  0x3d   :  { %237 = vmatpush.msrb.mxu1 %v106_v31 }
  0x3e   :  { %218 = vmatpush.msrb.mxu0 %v89_v32 }
  0x3f   :  { %238 = vmatpush.msrb.mxu1 %v105_v33 }
  0x40   :  { %219 = vmatpush.msrb.mxu0 %v88_v34 }
  0x41   :  { %239 = vmatpush.msrb.mxu1 %v104_v35  ;;  %220 = vmatmul.f32.vlgmr.msrb.gmra.mxu0 %v22_v36 }
  0x42   :  { %240 = vmatmul.f32.vlgmr.msrb.gmra.mxu1 %v23_v37 }
  0xa4   :  { %v141_v39 = vpop.f32.mrf.mxu0 }
  0xa5   :  { %v142_v40 = vadd.f32 %v311_v38, %v141_v39 }
  0xa7   :  { %v161_v41 = vpop.f32.mrf.mxu1 }
  0xa8   :  { %v162_v42 = vadd.f32 %v161_v41, %v142_v40  ;;  %v181_v43 = vpop.f32.mrf.mxu2 }
  0xaa   :  { %v182_v44 = vadd.f32 %v181_v43, %v162_v42 }
  0xab   :  { %v201_v45 = vpop.f32.mrf.mxu3 }
  0xac   :  { %v202_v46 = vadd.f32 %v201_v45, %v182_v44 }
  0xbe   :  { %v221_v47 = vpop.f32.mrf.mxu0 }
  0xbf   :  { %v241_v48 = vpop.f32.mrf.mxu1  ;;  %v222_v49 = vadd.f32 %v221_v47, %v202_v46 }
  0xc1   :  { %v242_v50 = vadd.f32 %v241_v48, %v222_v49 }
  0xc3   :  { %v260_v51 = vmul.f32 %v242_v50, %v242_v50 }
  0xc5   :  { %v261_v53 = vsel %vm245_vm0, %v260_v51, 0.0 }
  0xc6   :  { %262 = vadd.xlane.f32.xlu0 %v261_v53 }
  0xce   :  { %247 = vadd.xlane.f32.xlu0 %v246_v55 }
 0x139   :  { %v263_v56 = vpop.xlane.xlu0 %262 }
 0x13a   :  { %v264_v57 = vmax.f32 %v263_v56, 1e-16 }
 0x13c   :  { %312 = vrsqrt.f32 %v264_v57  ;;  %vm271_vm2 = vweird.f32 %v264_v57 }
 0x141   :  { %v248_v58 = vpop.xlane.xlu0 %247 }
 0x142   :  { %v313_v59 = vpop.eup %312  ;;  %v249_v60 = vmax.f32 %v248_v58, 1e-16 }
 0x143   :  { %v266_v61 = vmul.f32 %v313_v59, %v264_v57  ;;  %vm272_vm1 = vweird.f32 %v313_v59 }
 0x144   :  { %314 = vrsqrt.f32 %v249_v60  ;;  %vm273_vm3 = vmor %vm271_vm2, %vm272_vm1  ;;  %vm256_vm5 = vweird.f32 %v249_v60 }
 0x145   :  { %v267_v62 = vmul.f32 %v313_v59, %v266_v61 }
 0x147   :  { %v268_v63 = vmul.f32 0.5, %v267_v62 }
 0x149   :  { %v269_v0 = vsub.f32 1.5, %v268_v63 }
 0x14a   :  { %v315_v1 = vpop.eup %314 }
 0x14b   :  { %v251_v2 = vmul.f32 %v315_v1, %v249_v60  ;;  %v270_v3 = vmul.f32 %v313_v59, %v269_v0  ;;  %vm257_vm4 = vweird.f32 %v315_v1 }
 0x14c   :  { %vm258_vm6 = vmor %vm256_vm5, %vm257_vm4 }
 0x14d   :  { %v252_v4 = vmul.f32 %v315_v1, %v251_v2  ;;  %v274_v5 = vsel %vm273_vm3, %v313_v59, %v270_v3 }
 0x14e   :  { %v276_v6 = vmul.f32 %v274_v5, %v242_v50 }
 0x14f   :  { %v253_v7 = vmul.f32 0.5, %v252_v4 }
 0x150   :  { %309 = vmatpush.xpose.msk.msrb.mxu2 %vm245_vm0, %v276_v6 }
 0x151   :  { %v254_v8 = vsub.f32 1.5, %v253_v7 }
 0x153   :  { %v255_v9 = vmul.f32 %v315_v1, %v254_v8 }
 0x155   :  { %v259_v10 = vsel %vm258_vm6, %v315_v1, %v255_v9 }
 0x156   :  { %v275_v11 = vmul.f32 %v259_v10, %v17_v52 }
 0x158   :  { %310 = vmatmul.msk.f32.vlgmr.msrb.gmra.mxu2 %vm245_vm0, %v275_v11 }
 0x1db   :  { %v300_v12 = vpop.f32.mrf.mxu2 }
 0x1dc   :  { %304 = vst.msk [vmem:[%s664_s4] sm:$0xff] %vm303_vm7, %v300_v12 }

</bundles_post_ra>
